<compile_context>
chip_gen: v7x
topology: tpu7x:2x2x1
jax: 0.10.0
libtpu: 0.0.40
codegen_flags: <defaults>
</compile_context>

<pallas_src>
import jax
import jax.numpy as jnp
from jax.experimental import pallas as pl
from jax.experimental.pallas import tpu as pltpu

LANES = 128


def _round_up(x: int, m: int) -> int:
    return ((x + m - 1) // m) * m


def _cdiv(a: int, b: int) -> int:
    return (a + b - 1) // b


def _clamp_kernel(bounds_ref, x_ref, o_ref):
    # bounds_ref: (2,) float32 in SMEM -> [min_val, max_val]
    x = x_ref[...]
    lo = bounds_ref[0].astype(x.dtype)
    hi = bounds_ref[1].astype(x.dtype)
    # max-then-min matches torch.clamp semantics (min > max => everything == max);
    # NaNs propagate as in torch.
    o_ref[...] = jnp.minimum(jnp.maximum(x, lo), hi)


def _launch(x_arr, bounds, block_shape, index_map, grid, blk_nbytes, in_place):
    # in + out, double-buffered, plus headroom; capped at 48 MiB so v7x
    # (64 MiB physical VMEM per TC) keeps compiler-scratch slack. Also raises
    # v5e's 16 MiB default scoped-VMEM limit.
    vmem_limit = min(48 * 1024 * 1024, 4 * blk_nbytes + (8 << 20))
    extra = {}
    if in_place:
        # x is input index 1 (bounds is index 0). Only beneficial when the
        # caller donates the argument at the jit boundary; otherwise XLA
        # inserts a defensive copy, so this is opt-in.
        extra["input_output_aliases"] = {1: 0}
    return pl.pallas_call(
        _clamp_kernel,
        out_shape=jax.ShapeDtypeStruct(x_arr.shape, x_arr.dtype),
        grid=grid,
        in_specs=[
            pl.BlockSpec(memory_space=pltpu.MemorySpace.SMEM),  # bounds
            pl.BlockSpec(block_shape, index_map),               # x tile
        ],
        out_specs=pl.BlockSpec(block_shape, index_map),
        compiler_params=pltpu.CompilerParams(
            dimension_semantics=("parallel",),
            vmem_limit_bytes=vmem_limit,
        ),
        **extra,
    )(bounds, x_arr)


def clamp_pallas(x, min_val=-1.0, max_val=1.0, *,
                 block_bytes=8 * 1024 * 1024,
                 min_pallas_bytes=512 * 1024,
                 in_place=False):
    """Elementwise clamp of `x` into [min_val, max_val]; same shape/dtype as input.

    block_bytes:      target bytes per grid step per buffer (8 MiB default keeps
                      double-buffered in+out at 32 MiB: safe on v7x, amortizes
                      the ~0.35 us per-step pipeline overhead on all chips).
    min_pallas_bytes: inputs smaller than this use plain jnp clamp (a 1-block
                      grid gains nothing over XLA's fused clamp).
    in_place:         alias the output onto the input buffer (pair with jit
                      donate_argnums).
    """
    orig_shape = x.shape
    dtype = x.dtype
    n = x.size
    if n == 0:
        return x

    itemsize = jnp.dtype(dtype).itemsize
    lo = jnp.asarray(min_val, dtype=dtype)
    hi = jnp.asarray(max_val, dtype=dtype)
    # TODO(synk): for integer dtypes, float->int cast of the bounds truncates
    # toward zero; verify against torch.clamp integer semantics before use.

    if n * itemsize < min_pallas_bytes:
        # Tiny tensors: custom-call launch + pipeline prologue isn't worth it.
        return jnp.minimum(jnp.maximum(x, lo), hi)

    # Sublane multiple scales with dtype packing (f32: 8, bf16: 16, int8: 32)
    # so bytes-per-grid-step stays constant across dtypes.
    sublane = max(8, 32 // itemsize)

    # Runtime bounds live in SMEM: varying (min, max) never forces a recompile.
    bounds = jnp.asarray([min_val, max_val], dtype=jnp.float32)

    if n % LANES == 0:
        # Fast path: free reshape to a lane-dense (rows, 128) slab.
        rows = n // LANES
        x2d = jnp.reshape(x, (rows, LANES))
        target_rows = max(sublane,
                          (block_bytes // (LANES * itemsize)) // sublane * sublane)
        # Guarantee >= 2 grid blocks whenever the data allows, so both v7x
        # TensorCores get work under dimension_semantics=("parallel",).
        half_rows = _round_up(_cdiv(rows, 2), sublane)
        tile_rows = max(sublane, min(target_rows, half_rows))
        grid = (_cdiv(rows, tile_rows),)
        out = _launch(x2d, bounds, (tile_rows, LANES), lambda i: (i, 0), grid,
                      tile_rows * LANES * itemsize, in_place)
        return out.reshape(orig_shape)

    # Ragged path (numel % 128 != 0): run over the flat 1D array and let Pallas
    # mask the partial last block -- no whole-array pad / slice round trips
    # (those would ~3x the HBM traffic of this bandwidth-bound op).
    x1d = jnp.ravel(x)
    chunk = sublane * LANES
    target_elems = max(chunk, (block_bytes // itemsize) // chunk * chunk)
    half_elems = _round_up(_cdiv(n, 2), chunk)
    blk = max(chunk, min(target_elems, half_elems))
    grid = (_cdiv(n, blk),)
    out = _launch(x1d, bounds, (blk,), lambda i: (i,), grid,
                  blk * itemsize, in_place)
    return out.reshape(orig_shape)


if __name__ == "__main__":
    min_val, max_val = -1.0, 1.0
    keys = jax.random.split(jax.random.PRNGKey(0), 6)

    def ref_clamp(t):
        return jnp.minimum(jnp.maximum(t, jnp.asarray(min_val, t.dtype)),
                           jnp.asarray(max_val, t.dtype))

    # 1) Small lane-aligned NCHW input -> 2D (rows, 128) path, 2-block grid.
    x1 = jax.random.normal(keys[0], (2, 4, 16, 16), dtype=jnp.float32) * 3.0
    y1 = jax.block_until_ready(clamp_pallas(x1, min_val, max_val, min_pallas_bytes=0))
    assert y1.shape == x1.shape and y1.dtype == x1.dtype
    assert jnp.allclose(y1, ref_clamp(x1))

    # 2) Aligned but smaller than one tile (rows=3 < tile_rows=8): masked 2D block.
    x2 = jax.random.normal(keys[1], (3, 128), dtype=jnp.float32) * 3.0
    y2 = jax.block_until_ready(clamp_pallas(x2, min_val, max_val, min_pallas_bytes=0))
    assert jnp.allclose(y2, ref_clamp(x2))

    # 3) Ragged numel (231): 1D path, single partially-masked block.
    x3 = jax.random.normal(keys[2], (3, 7, 11), dtype=jnp.float32) * 3.0
    y3 = jax.block_until_ready(clamp_pallas(x3, min_val, max_val, min_pallas_bytes=0))
    assert y3.shape == x3.shape and jnp.allclose(y3, ref_clamp(x3))

    # 4) Ragged, multi-block 1D path (5000 elems -> 2 blocks, partial tail).
    x4 = jax.random.normal(keys[3], (5, 1000), dtype=jnp.float32) * 3.0
    y4 = jax.block_until_ready(clamp_pallas(x4, min_val, max_val, min_pallas_bytes=0))
    assert jnp.allclose(y4, ref_clamp(x4))

    # 5) bf16 input (dtype-scaled sublane=16), aligned, masked tail rows in 2D.
    x5 = (jax.random.normal(keys[4], (4, 16, 160), dtype=jnp.float32) * 3.0
          ).astype(jnp.bfloat16)
    y5 = jax.block_until_ready(clamp_pallas(x5, min_val, max_val, min_pallas_bytes=0))
    assert y5.dtype == jnp.bfloat16
    assert jnp.allclose(y5.astype(jnp.float32), ref_clamp(x5).astype(jnp.float32))

    # 6) Donated + aliased (in_place) jitted call.
    x6 = jax.random.normal(keys[5], (2, 4, 16, 16), dtype=jnp.float32) * 3.0
    ref6 = jax.block_until_ready(ref_clamp(x6))
    clamp_inplace = jax.jit(
        lambda t: clamp_pallas(t, min_val, max_val, min_pallas_bytes=0, in_place=True),
        donate_argnums=0)
    y6 = jax.block_until_ready(clamp_inplace(x6))
    assert jnp.allclose(y6, ref6)

    # 7) Default threshold -> tiny input takes the fused-jnp fallback path.
    x7 = jax.random.normal(jax.random.PRNGKey(7), (2, 4, 16, 16), dtype=jnp.float32) * 3.0
    y7 = jax.block_until_ready(clamp_pallas(x7, min_val, max_val))
    assert jnp.allclose(y7, ref_clamp(x7))

    print("KERNEL_OK")
</pallas_src>

<mosaic_0001>
module attributes {stable_mosaic.version = 11 : i64} {
  func.func @_clamp_kernel(%arg0: i32, %arg1: memref<2xf32, #tpu.memory_space<smem>>, %arg2: memref<8x128xf32, #tpu.memory_space<vmem>>, %arg3: memref<8x128xf32, #tpu.memory_space<vmem>>) attributes {dimension_semantics = [#tpu.dimension_semantics<parallel>], iteration_bounds = array<i64: 2>, scalar_prefetch = 0 : i64, scratch_operands = 0 : i64, tpu.core_type = #tpu.core_type<tc>, window_params = [{transform_indices = @transform_0, window_bounds = array<i64: 2>}, {transform_indices = @transform_1, window_bounds = array<i64: 8, 128>}, {transform_indices = @transform_2, window_bounds = array<i64: 8, 128>}]} {
    %c0 = arith.constant 0 : index
    %c0_0 = arith.constant 0 : index
    %0 = vector.load %arg2[%c0, %c0_0] : memref<8x128xf32, #tpu.memory_space<vmem>>, vector<8x128xf32>
    %c0_1 = arith.constant 0 : index
    %1 = memref.load %arg1[%c0_1] : memref<2xf32, #tpu.memory_space<smem>>
    %c1 = arith.constant 1 : index
    %2 = memref.load %arg1[%c1] : memref<2xf32, #tpu.memory_space<smem>>
    %3 = vector.broadcast %1 : f32 to vector<8x128xf32>
    %4 = arith.maximumf %0, %3 : vector<8x128xf32>
    %5 = vector.broadcast %2 : f32 to vector<8x128xf32>
    %6 = arith.minimumf %4, %5 : vector<8x128xf32>
    %c0_2 = arith.constant 0 : index
    %c0_3 = arith.constant 0 : index
    %7 = vector.load %arg3[%c0_2, %c0_3] : memref<8x128xf32, #tpu.memory_space<vmem>>, vector<8x128xf32>
    tpu.vector_store %arg3[%c0_2, %c0_3], %6 {strides = array<i32>} : memref<8x128xf32, #tpu.memory_space<vmem>>, vector<8x128xf32>,
    return
  }
  func.func @transform_0(%arg0: i32) -> i32 {
    %c0_i32 = arith.constant 0 : i32
    %c0_i32_0 = arith.constant 0 : i32
    return %c0_i32 : i32
  }
  func.func @transform_1(%arg0: i32) -> (i32, i32) {
    %c0_i32 = arith.constant 0 : i32
    %c0_i32_0 = arith.constant 0 : i32
    return %arg0, %c0_i32 : i32, i32
  }
  func.func @transform_2(%arg0: i32) -> (i32, i32) {
    %c0_i32 = arith.constant 0 : i32
    %c0_i32_0 = arith.constant 0 : i32
    return %arg0, %c0_i32 : i32, i32
  }
}

</mosaic_0001>

<bundles_post_ra>
// kernel: tpu_custom_call.1
= control target key start
LH: loop header
LB: loop body
LE: loop exit
PB: predicated region body
PF: predicated region fallthrough
CT: control target
= control target key end

     0   :  { %7 = vsyncpa [#allocation5], 0  ;;  %s685_s0 = inlined_call_operand.hbm [shape: f32[2], index: 0, kind: input, shape index: {}]   ;;  %s686_s1 = inlined_call_operand.hbm [shape: f32[16,128], index: 1, kind: input, shape index: {}]   ;;  %s687_s2 = inlined_call_operand.hbm [shape: f32[16,128], index: 2, kind: output, shape index: {}]  }
   0x1   :  { %8 = vsyncpa [#allocation3], 0 }
   0x2   :  { %10 = vsyncpa [#allocation3 + $0x1], 0 }
   0x3   :  { %11 = vsyncpa [#allocation4], 0 }
   0x4   :  { %13 = vsyncpa [#allocation4 + $0x1], 0  ;;  %s480_s9 = smov 0   ;;  %s482_s10 = smov 0  }
   0x5   :  { %s484_s11 = smov 0   ;;  %s486_s12 = smov 0  }
   0x6 LB: > { %s501_s13 = sadd.s32 4294967295, %s460_s12   ;;  %s275_s14 = sadd.s32 4294967294, %s460_s12   ;;  %s460_s12 = sphi %s486_s12, %s708_s12   ;;  %s456_s11 = sphi %s484_s11, %s707_s11   ;;  %s452_s10 = sphi %s482_s10, %s706_s10   ;;  %s448_s9 = sphi %s480_s9, %s705_s9  }
   0x7   : > { %p60_p0 = scmp.ne.s32.totalorder %s452_s10, %s448_s9  ;;  %p688_p1 = scmp.eq.s32.totalorder %s501_s13, 0 }
   0x8   : > { %p90_p3 = scmp.eq.s32.totalorder %s275_s14, 1  ;;  %p276_p5 = scmp.ge.s32.totalorder %s460_s12, 1 }
   0x9   : > { %p510_p4 = por %p688_p1, %p60_p0  ;;  %p97_p7 = scmp.lt.s32.totalorder %s460_s12, 3 }
   0xa   : > { %p515_p6 = por %p90_p3, %p60_p0  ;;  %s526_s18 = sadd.s32 1, %s460_s12  }
   0xb   : > { %s691_s15 = scalar_select %p510_p4, 1, 0 }
   0xc   : > { %s692_s16 = scalar_select %p515_p6, 1, 0 }
   0xd   : > { %p520_p8 = pnand %p276_p5, %p97_p7  ;;  %s44_s19 = ssub.s32 %s460_s12, %s526_s18 }
   0xe   : > { %s47_s20 = sadd.s32 1, %s456_s11  ;;  %p539_p12 = scmp.eq.s32.totalorder %s44_s19, 0 }
   0xf   : > { %p298_p10 = pneg %p520_p8  ;;  %p54_p13 = scmp.ne.s32.totalorder %s456_s11, %s452_s10 }
  0x10   : > { %p55_p0 = scmp.eq.s32.totalorder %s460_s12, 0  ;;  %p311_p3 = scmp.lt.s32.totalorder %s460_s12, 2 }
  0x11   : > { %p535_p11 = pnand %p298_p10, %p688_p1  ;;  %s347_s25 = scalar_lea.hbm %s685_s0, 16 }
  0x12   : > { %p348_p5 = scmp.ne.s32.totalorder %s685_s0, %s347_s25  ;;  %p354_p1 = scmp.lt.u32.totalorder %s347_s25, %s685_s0 }
  0x13   : > { %p349_p7 = pneg %p535_p11 }
  0x15   : > { %p350_p10 = pnand %p349_p7, %p348_p5 }
  0x17   : > { %p351_p9 = pneg %p350_p10 }
  0x19   : > { %p356_p2 = pnand %p354_p1, %p351_p9 }
  0x1b   : > { %359 = shalt.err (!%p356_p2)
}
  0x1c   : > { %s462_s30 = smov [#allocation2]   ;;  %p56_p1 = por %p55_p0, %p54_p13 }
  0x1d   : > { %301 = dma.hbm_to_smem (!%p535_p11), %s685_s0, 16, %s462_s30, [#allocation5]  }
  0x1e   : > { %s566_s5 = scalar_select %p539_p12, %s456_s11, %s47_s20  }
  0x1f   : > { %p696_p2 = scmp.eq.s32.totalorder %s501_s13, 1  ;;  %s119_s7 = sand.u32 1, %s456_s11  }
  0x20   : > { %s280_s8 = sshll.u32 %s460_s12, 7  ;;  %s279_s14 = sshll.u32 %s119_s7, 3 }
  0x21   : > { %p578_p9 = por %p696_p2, %p54_p13  ;;  %s587_s23 = scalar_lea.hbm %s686_s1, %s280_s8 }
  0x22   : > { %s123_s20 = scalar_lea.vmem [#allocation6], %s279_s14  ;;  %p591_p11 = pnand %p311_p3, %p56_p1 }
  0x23   : > { %s697_s6 = scalar_select %p578_p9, 1, 0 }
  0x24   : > { %s130_s22 = sshll.u32 %s123_s20, 4  ;;  %s120_s25 = scalar_lea.sflag [#allocation3], %s119_s7  ;;  %s595_s22 = int_to_ptr.vmem [resolvable:$true] %s130_s22 }
  0x25   : > { %s360_s26 = scalar_lea.hbm %s587_s23, 128  ;;  %p362_p13 = pneg %p591_p11 }
  0x26   : > { %p361_p12 = scmp.ne.s32.totalorder %s587_s23, %s360_s26  ;;  %s365_s29 = scalar_lea.hbm %s686_s1, 256 }
  0x27   : > { %p366_p3 = scmp.lt.u32.totalorder %s587_s23, %s686_s1  ;;  %p367_p7 = scmp.lt.u32.totalorder %s365_s29, %s360_s26 }
  0x28   : > { %p363_p0 = pnand %p362_p13, %p361_p12  ;;  %p369_p1 = scmp.lt.u32.totalorder %s360_s26, %s587_s23 }
  0x29   : > { %p368_p10 = por %p367_p7, %p366_p3 }
  0x2a   : > { %p364_p5 = pneg %p363_p0 }
  0x2b   : > { %p370_p2 = por %p369_p1, %p368_p10 }
  0x2d   : > { %p371_p6 = pnand %p370_p2, %p364_p5 }
  0x2f   : > { %374 = shalt.err (!%p371_p6)
}
  0x30   : > { %s375_s4 = scalar_lea.vmem %s595_s22, 128  ;;  %s463_s7 = smov [#allocation6]  }
  0x31   : > { %p376_p12 = scmp.ne.s32.totalorder %s595_s22, %s375_s4  ;;  %s380_s8 = sshll.u32 %s463_s7, 4  ;;  %s381_s8 = int_to_ptr.vmem [resolvable:$false] %s380_s8 }
  0x32   : > { %s382_s14 = scalar_lea.vmem %s381_s8, 256  ;;  %p383_p4 = scmp.lt.s32.totalorder %s595_s22, %s381_s8 }
  0x33   : > { %p378_p0 = pnand %p376_p12, %p362_p13  ;;  %p384_p3 = scmp.lt.s32.totalorder %s382_s14, %s375_s4 }
  0x35   : > { %p379_p9 = pneg %p378_p0  ;;  %p385_p7 = por %p384_p3, %p383_p4 }
  0x37   : > { %p386_p10 = pnand %p385_p7, %p379_p9 }
  0x39   : > { %389 = shalt.err (!%p386_p10)
}
  0x3a   : > { %305 = dma.hbm_to_vmem [thread:$0]  (!%p591_p11), %s587_s23, 128, %s595_s22, %s120_s25  }
  0x3b   : > { %139 = sbr.rel (%p520_p8) target bundleno = 100 (0x64), region = 28  ;;  %p699_p6 = scmp.eq.s32.totalorder (!%p520_p8), %s501_s13, 0 }
  0x42   : > { %435 = dma.done.wait (%p699_p6), [#allocation5], 16   ;;  %p700_p13 = pmov %p699_p6 }
  0x43   : > { %s629_s19 = sand.u32 1, %s452_s10   ;;  %p701_p4 = scmp.ne.s32.totalorder %s691_s15, 0 }
  0x44   : > { %437 = vsyncadd (%p700_p13), [#allocation5], 4294967280  ;;  %s283_s21 = sshll.u32 %s629_s19, 3  ;;  %s146_s20 = scalar_lea.sflag [#allocation3], %s629_s19 }
  0x45   : > { %s149_s24 = scalar_lea.vmem [#allocation6], %s283_s21 }
  0x46   : > { %439 = dma.done.wait (%p701_p4), %s146_s20, 128  }
  0x47   : > { %441 = vsyncadd (%p701_p4), %s146_s20, 4294967168 }
  0x48   : > { %154 = sfence }
  0x49   : > { %s172_s17 = sld [smem:[#allocation2]]  ;;  %s285_s23 = sld [smem:[#allocation2 + $0x1]]  ;;  %v171_v0 = vld [vmem:[%s149_s24] sm:$0xff] }
  0x4a   : > { %s170_s22 = scalar_lea.vmem [#allocation7], %s283_s21  ;;  %s287_s26 = sshll.u32 %s501_s13, 7 }
  0x4b   : > { %s193_s25 = sshll.u32 %s170_s22, 4  ;;  %s643_s28 = scalar_lea.hbm %s687_s2, %s287_s26  ;;  %s638_s25 = int_to_ptr.vmem [resolvable:$true] %s193_s25 }
  0x4c   : > { %s180_s29 = scalar_lea.sflag [#allocation4], %s629_s19  ;;  %s390_s30 = scalar_lea.vmem %s638_s25, 128 }
  0x4d   : > { %p391_p8 = scmp.ne.s32.totalorder %s638_s25, %s390_s30  ;;  %p702_p9 = scmp.ne.s32.totalorder %s697_s6, 0 }
  0x4e   : > { %s464_s13 = smov [#allocation7]  }
  0x4f   : > { %v174_v1 = vstv %s172_s17  ;;  %v176_v3 = vstv %s285_s23  ;;  %p392_p11 = pnand %p391_p8, %p702_p9  ;;  %s394_s3 = sshll.u32 %s464_s13, 4  ;;  %s395_s3 = int_to_ptr.vmem [resolvable:$false] %s394_s3 }
  0x50   : > { %v175_v2 = vmax.f32 %v171_v0, %v174_v1  ;;  %s396_s4 = scalar_lea.vmem %s395_s3, 256  ;;  %p397_p1 = scmp.lt.s32.totalorder %s638_s25, %s395_s3 }
  0x51   : > { %p393_p5 = pneg %p392_p11  ;;  %p398_p2 = scmp.lt.s32.totalorder %s396_s4, %s390_s30 }
  0x52   : > { %v177_v4 = vmin.f32 %v175_v2, %v176_v3 }
  0x53   : > { %p399_p12 = por %p398_p2, %p397_p1 }
  0x54   : > { %178 = vst [vmem:[%s170_s22] sm:$0xff] %v177_v4 }
  0x55   : > { %p400_p0 = pnand %p399_p12, %p393_p5 }
  0x57   : > { %403 = shalt.err (!%p400_p0)
}
  0x58   : > { %s404_s7 = scalar_lea.hbm %s643_s28, 128  ;;  %s408_s19 = scalar_lea.hbm %s687_s2, 256 }
  0x59   : > { %p405_p3 = scmp.ne.s32.totalorder %s643_s28, %s404_s7  ;;  %p409_p6 = scmp.lt.u32.totalorder %s643_s28, %s687_s2 }
  0x5a   : > { %p410_p13 = scmp.lt.u32.totalorder %s408_s19, %s404_s7  ;;  %p412_p8 = scmp.lt.u32.totalorder %s404_s7, %s643_s28 }
  0x5b   : > { %p406_p7 = pnand %p405_p3, %p702_p9 }
  0x5c   : > { %p411_p4 = por %p410_p13, %p409_p6 }
  0x5d   : > { %p407_p10 = pneg %p406_p7 }
  0x5e   : > { %p413_p11 = por %p412_p8, %p411_p4 }
  0x60   : > { %p414_p5 = pnand %p413_p11, %p407_p10 }
  0x62   : > { %417 = shalt.err (!%p414_p5)
}
  0x63   : > { %296 = dma.vmem_to_hbm [thread:$0]  (%p702_p9), %s638_s25, 128, %s643_s28, %s180_s29  }
  0x64 PF: > { %s205_s24 = sand.u32 1, %s448_s9   ;;  %p703_p1 = scmp.ne.s32.totalorder %s692_s16, 0 }
  0x65   : > { %p704_p2 = scmp.ge.s32.totalorder %s460_s12, 2  ;;  %s206_s17 = scalar_lea.sflag [#allocation4], %s205_s24 }
  0x67   : > { %p307_p12 = pnand %p704_p2, %p703_p1 }
  0x69   : > { %443 = dma.done.wait (!%p307_p12), %s206_s17, 128  }
  0x6a   : > { %445 = vsyncadd (!%p307_p12), %s206_s17, 4294967168  ;;  %p16_p0 = scmp.ge.s32.totalorder %s526_s18, 4   ;;  %s705_s9 = smov %s452_s10 }
  0x6b   : > { %s706_s10 = smov %s456_s11  ;;  %s707_s11 = smov %s566_s5 }
  0x6c   : > { %s708_s12 = smov %s526_s18  ;;  %18 = sbr.rel (!%p16_p0) target bundleno = 6 (0x6), region = 78 }
  0x73   :  { %211 = vsyncpa [#allocation3], 1 }
  0x74   :  { %213 = vsyncpa [#allocation3 + $0x1], 1 }
  0x75   :  { %214 = vsyncpa [#allocation4], 1 }
  0x76   :  { %216 = vsyncpa [#allocation4 + $0x1], 1 }
  0x77   :  { %217 = vsyncpa [#allocation5], 1 }
  0x78   :  { %219 = vsyncpa [#allocation5 + $0x1], 1 }

</bundles_post_ra>
